<compile_context>
chip_gen: v5e
topology: v5e:2x2
jax: 0.10.0
libtpu: 0.0.40
codegen_flags: <defaults>
</compile_context>

<pallas_src>
import functools

import jax
import jax.numpy as jnp
from jax.experimental import pallas as pl
from jax.experimental.pallas import tpu as pltpu

M = 64           # hidden size
N = 28 * 28      # 784 input features
M_PAD = 128      # hidden padded to one full lane width (do NOT widen to 256)


def _round_up(x, m):
    return (x + m - 1) // m * m


def _ae_fwd_kernel(x_ref, we_ref, be_ref, wd_ref, bd_ref, out_ref):
    """Fused encoder+decoder on one (TB, 784) batch tile.

    out = sigmoid(sigmoid(x @ We + be) @ Wd + bd)
    bf16 operands on the MXU, f32 accumulation, f32 bias/sigmoid, f32 store.
    """
    x = x_ref[...].astype(jnp.bfloat16)                               # (TB, 784)
    h = jnp.dot(x, we_ref[...], preferred_element_type=jnp.float32)   # (TB, 128)
    h = jax.nn.sigmoid(h + be_ref[...])                               # encoder
    o = jnp.dot(h.astype(jnp.bfloat16), wd_ref[...],
                preferred_element_type=jnp.float32)                   # (TB, 784)
    o = jax.nn.sigmoid(o + bd_ref[...])                               # decoder
    out_ref[...] = o.astype(out_ref.dtype)


def prepare_params(we_t, be, wd_t, bd):
    """One-time prep: pad hidden 64 -> 128, cast weights to bf16.

    we_t: (784, 64), be: (1, 64), wd_t: (64, 784), bd: (1, 784).
    Padded We cols / be entries give sigmoid(0)=0.5 hidden lanes, but the
    matching Wd rows are exact zeros, so the decoder dot is unaffected.
    """
    we_p = jnp.zeros((N, M_PAD), jnp.bfloat16).at[:, :M].set(
        we_t.astype(jnp.bfloat16))
    be_p = jnp.zeros((1, M_PAD), jnp.float32).at[:, :M].set(
        be.astype(jnp.float32))
    wd_p = jnp.zeros((M_PAD, N), jnp.bfloat16).at[:M, :].set(
        wd_t.astype(jnp.bfloat16))
    bd_p = bd.astype(jnp.float32).reshape(1, N)
    return we_p, be_p, wd_p, bd_p


def _choose_tb(batch, max_tb):
    """Balanced batch tile: multiple of 8, <= max_tb, >=2 tiles when B>=256."""
    n_tiles = max(1, -(-batch // max_tb))          # cdiv
    if batch >= 256 and n_tiles < 2:
        n_tiles = 2                                # feed both v7x TensorCores
    return _round_up(-(-batch // n_tiles), 8)


@functools.partial(jax.jit, static_argnames=("max_tb", "out_dtype"))
def aes_forward(x, we_p, be_p, wd_p, bd_p, *, max_tb=1024,
                out_dtype=jnp.float32):
    """x: (B, 784) f32; params as produced by prepare_params()."""
    B, n = x.shape
    assert n == N
    assert we_p.shape == (N, M_PAD) and wd_p.shape == (M_PAD, N)
    assert be_p.shape == (1, M_PAD) and bd_p.shape == (1, N)

    TB = _choose_tb(B, max_tb)
    grid = (pl.cdiv(B, TB),)

    return pl.pallas_call(
        _ae_fwd_kernel,
        out_shape=jax.ShapeDtypeStruct((B, N), out_dtype),
        grid=grid,
        in_specs=[
            pl.BlockSpec((TB, N), lambda i: (i, 0)),       # x: batch-tiled, f32
            pl.BlockSpec((N, M_PAD), lambda i: (0, 0)),    # We: resident
            pl.BlockSpec((1, M_PAD), lambda i: (0, 0)),    # be: resident
            pl.BlockSpec((M_PAD, N), lambda i: (0, 0)),    # Wd: resident
            pl.BlockSpec((1, N), lambda i: (0, 0)),        # bd: resident
        ],
        out_specs=pl.BlockSpec((TB, N), lambda i: (i, 0)),
        compiler_params=pltpu.CompilerParams(
            dimension_semantics=("parallel",),   # megacore shard on v7x
            vmem_limit_bytes=32 << 20,           # fits TB<=1024 on v5e/v6e/v7x
        ),
    )(x, we_p, be_p, wd_p, bd_p)


def _init_params(key):
    """Deterministic init matching torch.nn.Linear's U(-1/sqrt(fan_in), ...)."""
    k1, k2, k3, k4 = jax.random.split(key, 4)
    bound_e = 1.0 / jnp.sqrt(jnp.float32(N))   # encoder fan_in = N
    bound_d = 1.0 / jnp.sqrt(jnp.float32(M))   # decoder fan_in = M
    we_t = jax.random.uniform(k1, (N, M), jnp.float32, -bound_e, bound_e)
    be = jax.random.uniform(k2, (1, M), jnp.float32, -bound_e, bound_e)
    wd_t = jax.random.uniform(k3, (M, N), jnp.float32, -bound_d, bound_d)
    bd = jax.random.uniform(k4, (1, N), jnp.float32, -bound_d, bound_d)
    return we_t, be, wd_t, bd


def _reference(x, we_t, be, wd_t, bd):
    """Plain-JAX reference with the same bf16-operand / f32-accumulate policy."""
    xb = x.astype(jnp.bfloat16).astype(jnp.float32)
    web = we_t.astype(jnp.bfloat16).astype(jnp.float32)
    wdb = wd_t.astype(jnp.bfloat16).astype(jnp.float32)
    h = jax.nn.sigmoid(
        jnp.dot(xb, web, precision=jax.lax.Precision.HIGHEST) + be)
    hb = h.astype(jnp.bfloat16).astype(jnp.float32)
    return jax.nn.sigmoid(
        jnp.dot(hb, wdb, precision=jax.lax.Precision.HIGHEST) + bd)


if __name__ == "__main__":
    key = jax.random.PRNGKey(0)
    kx, kp = jax.random.split(key)

    B = 8  # small batch; flattened (B, 1, 28, 28) -> (B, 784)
    x = jax.random.normal(kx, (B, N), jnp.float32)
    we_t, be, wd_t, bd = _init_params(kp)

    # One-time parameter prep (hoisted out of the per-call path).
    params = prepare_params(we_t, be, wd_t, bd)

    out = aes_forward(x, *params)
    out = jax.block_until_ready(out)

    ref = _reference(x, we_t, be, wd_t, bd)
    assert out.shape == (B, N)
    assert jnp.allclose(out, ref, atol=2e-3, rtol=2e-3), "mismatch vs reference"

    print("KERNEL_OK")
</pallas_src>

<mosaic_0001>
module attributes {stable_mosaic.version = 11 : i64} {
  func.func @_ae_fwd_kernel(%arg0: i32, %arg1: memref<8x784xf32, #tpu.memory_space<vmem>>, %arg2: memref<784x128xbf16, #tpu.memory_space<vmem>>, %arg3: memref<1x128xf32, #tpu.memory_space<vmem>>, %arg4: memref<128x784xbf16, #tpu.memory_space<vmem>>, %arg5: memref<1x784xf32, #tpu.memory_space<vmem>>, %arg6: memref<8x784xf32, #tpu.memory_space<vmem>>) attributes {dimension_semantics = [#tpu.dimension_semantics<parallel>], iteration_bounds = array<i64: 1>, scalar_prefetch = 0 : i64, scratch_operands = 0 : i64, tpu.core_type = #tpu.core_type<tc>, window_params = [{transform_indices = @transform_0, window_bounds = array<i64: 8, 784>}, {pipeline_mode = #tpu.pipeline_mode<synchronous>, transform_indices = @transform_1, window_bounds = array<i64: 784, 128>}, {pipeline_mode = #tpu.pipeline_mode<synchronous>, transform_indices = @transform_2, window_bounds = array<i64: 1, 128>}, {pipeline_mode = #tpu.pipeline_mode<synchronous>, transform_indices = @transform_3, window_bounds = array<i64: 128, 784>}, {pipeline_mode = #tpu.pipeline_mode<synchronous>, transform_indices = @transform_4, window_bounds = array<i64: 1, 784>}, {transform_indices = @transform_5, window_bounds = array<i64: 8, 784>}]} {
    %c0 = arith.constant 0 : index
    %c0_0 = arith.constant 0 : index
    %0 = vector.load %arg1[%c0, %c0_0] : memref<8x784xf32, #tpu.memory_space<vmem>>, vector<8x784xf32>
    %1 = arith.truncf %0 : vector<8x784xf32> to vector<8x784xbf16>
    %c0_1 = arith.constant 0 : index
    %c0_2 = arith.constant 0 : index
    %2 = vector.load %arg2[%c0_1, %c0_2] : memref<784x128xbf16, #tpu.memory_space<vmem>>, vector<784x128xbf16>
    %cst = arith.constant dense<0.000000e+00> : vector<8x128xf32>
    %3 = tpu.matmul %1, %2, %cst {dimension_numbers = #tpu.dot_dimension_numbers<[1], [0], [0], [1], [0, 0, 1, 1], [], []>} : vector<8x784xbf16>, vector<784x128xbf16>, vector<8x128xf32> -> vector<8x128xf32>
    %c0_3 = arith.constant 0 : index
    %c0_4 = arith.constant 0 : index
    %4 = vector.load %arg3[%c0_3, %c0_4] : memref<1x128xf32, #tpu.memory_space<vmem>>, vector<1x128xf32>
    %5 = vector.broadcast %4 : vector<1x128xf32> to vector<8x128xf32>
    %6 = arith.addf %3, %5 : vector<8x128xf32>
    %7 = arith.negf %6 : vector<8x128xf32>
    %8 = math.exp %7 : vector<8x128xf32>
    %cst_5 = arith.constant 1.000000e+00 : f32
    %9 = vector.broadcast %cst_5 : f32 to vector<8x128xf32>
    %10 = arith.addf %9, %8 : vector<8x128xf32>
    %11 = arith.divf %9, %10 : vector<8x128xf32>
    %12 = arith.truncf %11 : vector<8x128xf32> to vector<8x128xbf16>
    %c0_6 = arith.constant 0 : index
    %c0_7 = arith.constant 0 : index
    %13 = vector.load %arg4[%c0_6, %c0_7] : memref<128x784xbf16, #tpu.memory_space<vmem>>, vector<128x784xbf16>
    %cst_8 = arith.constant dense<0.000000e+00> : vector<8x784xf32>
    %14 = tpu.matmul %12, %13, %cst_8 {dimension_numbers = #tpu.dot_dimension_numbers<[1], [0], [0], [1], [0, 0, 1, 1], [], []>} : vector<8x128xbf16>, vector<128x784xbf16>, vector<8x784xf32> -> vector<8x784xf32>
    %c0_9 = arith.constant 0 : index
    %c0_10 = arith.constant 0 : index
    %15 = vector.load %arg5[%c0_9, %c0_10] : memref<1x784xf32, #tpu.memory_space<vmem>>, vector<1x784xf32>
    %16 = vector.broadcast %15 : vector<1x784xf32> to vector<8x784xf32>
    %17 = arith.addf %14, %16 : vector<8x784xf32>
    %18 = arith.negf %17 : vector<8x784xf32>
    %19 = math.exp %18 : vector<8x784xf32>
    %cst_11 = arith.constant 1.000000e+00 : f32
    %20 = vector.broadcast %cst_11 : f32 to vector<8x784xf32>
    %21 = arith.addf %20, %19 : vector<8x784xf32>
    %22 = arith.divf %20, %21 : vector<8x784xf32>
    %c0_12 = arith.constant 0 : index
    %c0_13 = arith.constant 0 : index
    %23 = vector.load %arg6[%c0_12, %c0_13] : memref<8x784xf32, #tpu.memory_space<vmem>>, vector<8x784xf32>
    tpu.vector_store %arg6[%c0_12, %c0_13], %22 {strides = array<i32>} : memref<8x784xf32, #tpu.memory_space<vmem>>, vector<8x784xf32>,
    return
  }
  func.func @transform_0(%arg0: i32) -> (i32, i32) {
    %c0_i32 = arith.constant 0 : i32
    %c0_i32_0 = arith.constant 0 : i32
    return %arg0, %c0_i32 : i32, i32
  }
  func.func @transform_1(%arg0: i32) -> (i32, i32) {
    %c0_i32 = arith.constant 0 : i32
    %c0_i32_0 = arith.constant 0 : i32
    %c0_i32_1 = arith.constant 0 : i32
    return %c0_i32, %c0_i32_0 : i32, i32
  }
  func.func @transform_2(%arg0: i32) -> (i32, i32) {
    %c0_i32 = arith.constant 0 : i32
    %c0_i32_0 = arith.constant 0 : i32
    %c0_i32_1 = arith.constant 0 : i32
    return %c0_i32, %c0_i32_0 : i32, i32
  }
  func.func @transform_3(%arg0: i32) -> (i32, i32) {
    %c0_i32 = arith.constant 0 : i32
    %c0_i32_0 = arith.constant 0 : i32
    %c0_i32_1 = arith.constant 0 : i32
    return %c0_i32, %c0_i32_0 : i32, i32
  }
  func.func @transform_4(%arg0: i32) -> (i32, i32) {
    %c0_i32 = arith.constant 0 : i32
    %c0_i32_0 = arith.constant 0 : i32
    %c0_i32_1 = arith.constant 0 : i32
    return %c0_i32, %c0_i32_0 : i32, i32
  }
  func.func @transform_5(%arg0: i32) -> (i32, i32) {
    %c0_i32 = arith.constant 0 : i32
    %c0_i32_0 = arith.constant 0 : i32
    return %arg0, %c0_i32 : i32, i32
  }
}

</mosaic_0001>

<bundles_post_ra>
// kernel: aes_forward.1
= control target key start
LH: loop header
LB: loop body
LE: loop exit
PB: predicated region body
PF: predicated region fallthrough
CT: control target
= control target key end

     0   :  { %s2344_s0 = inlined_call_operand.vmem [shape: f32[8,784], index: 0, kind: input, shape index: {}]   ;;  %s2345_s1 = inlined_call_operand.vmem [shape: bf16[784,128], index: 1, kind: input, shape index: {}]   ;;  %s2346_s2 = inlined_call_operand.vmem [shape: f32[1,128], index: 2, kind: input, shape index: {}]   ;;  %s2347_s3 = inlined_call_operand.vmem [shape: bf16[128,784], index: 3, kind: input, shape index: {}]   ;;  %s2348_s4 = inlined_call_operand.vmem [shape: f32[1,784], index: 4, kind: input, shape index: {}]   ;;  %s2349_s5 = inlined_call_operand.hbm [shape: f32[8,784], index: 5, kind: output, shape index: {}]  }
   0x1   :  { %v1598_v0 = vld [vmem:[%s2345_s1 + $0x38] sm:$0xff]  ;;  %v1597_v3 = vld [vmem:[%s2345_s1 + $0x30] sm:$0xff]  ;;  %v1596_v8 = vld [vmem:[%s2345_s1 + $0x28] sm:$0xff] }
   0x2   :  { %v1606_v1 = vld [vmem:[%s2345_s1 + $0x78] sm:$0xff]  ;;  %436 = vmatpush.bf16.msra.mxu0 %v1598_v0  ;;  %v1605_v4 = vld [vmem:[%s2345_s1 + $0x70] sm:$0xff]  ;;  %v1604_v9 = vld [vmem:[%s2345_s1 + $0x68] sm:$0xff] }
   0x3   :  { %v1614_v2 = vld [vmem:[%s2345_s1 + $0xb8] sm:$0xff]  ;;  %449 = vmatpush.bf16.msra.mxu1 %v1606_v1  ;;  %v1613_v5 = vld [vmem:[%s2345_s1 + $0xb0] sm:$0xff]  ;;  %v1612_v10 = vld [vmem:[%s2345_s1 + $0xa8] sm:$0xff] }
   0x4   :  { %462 = vmatpush.bf16.msra.mxu2 %v1614_v2  ;;  %v1622_v6 = vld [vmem:[%s2345_s1 + $0xf8] sm:$0xff]  ;;  %v1621_v7 = vld [vmem:[%s2345_s1 + $0xf0] sm:$0xff]  ;;  %v1620_v11 = vld [vmem:[%s2345_s1 + $0xe8] sm:$0xff] }
   0x5   :  { %475 = vmatpush.bf16.msra.mxu3 %v1622_v6  ;;  %v1595_v12 = vld [vmem:[%s2345_s1 + $0x20] sm:$0xff]  ;;  %v1594_v16 = vld [vmem:[%s2345_s1 + $0x18] sm:$0xff] }
   0x6   :  { %437 = vmatpush.bf16.msra.mxu0 %v1597_v3  ;;  %v1603_v13 = vld [vmem:[%s2345_s1 + $0x60] sm:$0xff]  ;;  %v1602_v17 = vld [vmem:[%s2345_s1 + $0x58] sm:$0xff] }
   0x7   :  { %450 = vmatpush.bf16.msra.mxu1 %v1605_v4  ;;  %v1611_v14 = vld [vmem:[%s2345_s1 + $0xa0] sm:$0xff]  ;;  %v1610_v18 = vld [vmem:[%s2345_s1 + $0x98] sm:$0xff] }
   0x8   :  { %463 = vmatpush.bf16.msra.mxu2 %v1613_v5  ;;  %v1619_v15 = vld [vmem:[%s2345_s1 + $0xe0] sm:$0xff] }
   0x9   :  { %476 = vmatpush.bf16.msra.mxu3 %v1621_v7 }
   0xa   :  { %438 = vmatpush.bf16.msra.mxu0 %v1596_v8 }
   0xb   :  { %451 = vmatpush.bf16.msra.mxu1 %v1604_v9 }
   0xc   :  { %464 = vmatpush.bf16.msra.mxu2 %v1612_v10 }
   0xd   :  { %477 = vmatpush.bf16.msra.mxu3 %v1620_v11 }
   0xe   :  { %439 = vmatpush.bf16.msra.mxu0 %v1595_v12 }
   0xf   :  { %452 = vmatpush.bf16.msra.mxu1 %v1603_v13 }
  0x10   :  { %465 = vmatpush.bf16.msra.mxu2 %v1611_v14 }
  0x11   :  { %10 = vsyncpa [#allocation3], 0  ;;  %478 = vmatpush.bf16.msra.mxu3 %v1619_v15  ;;  %v1618_v19 = vld [vmem:[%s2345_s1 + $0xd8] sm:$0xff]  ;;  %v1593_v20 = vld [vmem:[%s2345_s1 + $0x10] sm:$0xff]  ;;  %vm432_vm0 = vcmask 130048   ;;  %s1153_s12 = sshll.u32 %s2349_s5, 4  ;;  %s1154_s12 = int_to_ptr.hbm [resolvable:$true] %s1153_s12 }
  0x12   :  { %440 = vmatpush.bf16.msra.mxu0 %v1594_v16  ;;  %v1601_v21 = vld [vmem:[%s2345_s1 + $0x50] sm:$0xff]  ;;  %v1592_v24 = vld [vmem:[%s2345_s1 + $0x8] sm:$0xff]  ;;  %v1591_v27 = vld [vmem:[%s2345_s1] sm:$0xff] }
  0x13   :  { %453 = vmatpush.bf16.msra.mxu1 %v1602_v17  ;;  %v1609_v22 = vld [vmem:[%s2345_s1 + $0x90] sm:$0xff]  ;;  %v1600_v25 = vld [vmem:[%s2345_s1 + $0x48] sm:$0xff]  ;;  %v1599_v29 = vld [vmem:[%s2345_s1 + $0x40] sm:$0xff] }
  0x14   :  { %466 = vmatpush.bf16.msra.mxu2 %v1610_v18  ;;  %v1617_v23 = vld [vmem:[%s2345_s1 + $0xd0] sm:$0xff]  ;;  %v1608_v26 = vld [vmem:[%s2345_s1 + $0x88] sm:$0xff]  ;;  %v22_v30 = vld [vmem:[%s2344_s0] sm:$0xff] }
  0x15   :  { %479 = vmatpush.bf16.msra.mxu3 %v1618_v19  ;;  %v1616_v28 = vld [vmem:[%s2345_s1 + $0xc8] sm:$0xff]  ;;  %v1630_v32 = vld [vmem:[%s2345_s1 + $0x138] sm:$0xff]  ;;  %v1607_v34 = vld [vmem:[%s2345_s1 + $0x80] sm:$0xff]  ;;  %v29_v36 = vpack.c.bf16 %v22_v30, %v22_v30 }
  0x16   :  { %441 = vmatpush.bf16.msra.mxu0 %v1593_v20  ;;  %v23_v31 = vld [vmem:[%s2344_s0 + $0x8] sm:$0xff]  ;;  %v1638_v33 = vld [vmem:[%s2345_s1 + $0x178] sm:$0xff]  ;;  %v24_v35 = vld [vmem:[%s2344_s0 + $0x10] sm:$0xff] }
  0x17   :  { %454 = vmatpush.bf16.msra.mxu1 %v1601_v21  ;;  %v30_v37 = vpack.c.bf16 %v23_v31, %v23_v31  ;;  %v1615_v38 = vld [vmem:[%s2345_s1 + $0xc0] sm:$0xff]  ;;  %v25_v40 = vld [vmem:[%s2344_s0 + $0x18] sm:$0xff]  ;;  %v1629_v41 = vld [vmem:[%s2345_s1 + $0x130] sm:$0xff]  ;;  %v31_v43 = vpack.c.bf16 %v24_v35, %v24_v35 }
  0x18   :  { %467 = vmatpush.bf16.msra.mxu2 %v1609_v22  ;;  %v1639_v39 = vld [vmem:[%s2345_s1 + $0x180] sm:$0xff]  ;;  %v1637_v42 = vld [vmem:[%s2345_s1 + $0x170] sm:$0xff]  ;;  %v32_v44 = vpack.c.bf16 %v25_v40, %v25_v40  ;;  %v1628_v45 = vld [vmem:[%s2345_s1 + $0x128] sm:$0xff] }
  0x19   :  { %480 = vmatpush.bf16.msra.mxu3 %v1617_v23  ;;  %v1636_v46 = vld [vmem:[%s2345_s1 + $0x168] sm:$0xff]  ;;  %v1627_v47 = vld [vmem:[%s2345_s1 + $0x120] sm:$0xff]  ;;  %v1626_v49 = vld [vmem:[%s2345_s1 + $0x118] sm:$0xff] }
  0x1a   :  { %442 = vmatpush.bf16.msra.mxu0 %v1592_v24  ;;  %v1635_v48 = vld [vmem:[%s2345_s1 + $0x160] sm:$0xff]  ;;  %v1634_v50 = vld [vmem:[%s2345_s1 + $0x158] sm:$0xff]  ;;  %v28_v51 = vld [vmem:[%s2344_s0 + $0x30] sm:$0xff] }
  0x1b   :  { %455 = vmatpush.bf16.msra.mxu1 %v1600_v25  ;;  %v1625_v52 = vld [vmem:[%s2345_s1 + $0x110] sm:$0xff]  ;;  %v35_v54 = vpack.c.bf16 %v28_v51, %v28_v51  ;;  %v1624_v55 = vld [vmem:[%s2345_s1 + $0x108] sm:$0xff]  ;;  %v1623_v57 = vld [vmem:[%s2345_s1 + $0x100] sm:$0xff] }
  0x1c   :  { %468 = vmatpush.bf16.msra.mxu2 %v1608_v26  ;;  %v1633_v53 = vld [vmem:[%s2345_s1 + $0x150] sm:$0xff]  ;;  %v1632_v56 = vld [vmem:[%s2345_s1 + $0x148] sm:$0xff]  ;;  %v1631_v58 = vld [vmem:[%s2345_s1 + $0x140] sm:$0xff] }
  0x1d   :  { %481 = vmatpush.bf16.msra.mxu3 %v1616_v28  ;;  %v26_v59 = vld [vmem:[%s2344_s0 + $0x20] sm:$0xff]  ;;  %v27_v60 = vld [vmem:[%s2344_s0 + $0x28] sm:$0xff]  ;;  %v1566_v4 = vld [vmem:[%s2347_s3 + $0x190] sm:$0xf] }
  0x1e   :  { %443 = vmatpush.bf16.msra.mxu0 %v1591_v27  ;;  %v33_v61 = vpack.c.bf16 %v26_v59, %v26_v59  ;;  %v34_v62 = vpack.c.bf16 %v27_v60, %v27_v60  ;;  %v1558_v63 = vld [vmem:[%s2347_s3 + $0x188] sm:$0xf]  ;;  %v1692_v0 = vld [vmem:[%s2347_s3 + $0x1a0] sm:$0xf0]  ;;  %v1689_v1 = vld [vmem:[%s2347_s3 + $0x18c] sm:$0xf] }
  0x1f   :  { %456 = vmatpush.bf16.msra.mxu1 %v1599_v29  ;;  %v1559_v2 = vor.u32 %v1692_v0, %v1558_v63  ;;  %v1560_v3 = vld [vmem:[%s2347_s3 + $0x1a4] sm:$0xf0]  ;;  %v1693_v5 = vld [vmem:[%s2347_s3 + $0x1a8] sm:$0xf0]  ;;  %v1530_v8 = vld [vmem:[%s2347_s3 + $0x150] sm:$0xf] }
  0x20   :  { %469 = vmatpush.bf16.msra.mxu2 %v1607_v34  ;;  %v1563_v6 = vor.u32 %v1689_v1, %v1560_v3  ;;  %v1567_v7 = vor.u32 %v1693_v5, %v1566_v4  ;;  %v1685_v9 = vld [vmem:[%s2347_s3 + $0x168] sm:$0xf0]  ;;  %v1682_v10 = vld [vmem:[%s2347_s3 + $0x154] sm:$0xf]  ;;  %v1532_v12 = vld [vmem:[%s2347_s3 + $0x16c] sm:$0xf0] }
  0x21   :  { %444 = vmatmul.bf16.vlgmr.msra.gmra.mxu0 %v29_v36  ;;  %482 = vmatpush.bf16.msra.mxu3 %v1615_v38  ;;  %v1531_v11 = vor.u32 %v1685_v9, %v1530_v8  ;;  %v1538_v13 = vld [vmem:[%s2347_s3 + $0x158] sm:$0xf]  ;;  %v1686_v14 = vld [vmem:[%s2347_s3 + $0x170] sm:$0xf0]  ;;  %v1535_v15 = vor.u32 %v1682_v10, %v1532_v12  ;;  %v1675_v19 = vld [vmem:[%s2347_s3 + $0x11c] sm:$0xf] }
  0x22   :  { %488 = vmatpush.bf16.msrb.mxu0 %v1630_v32  ;;  %457 = vmatmul.bf16.vlgmr.msra.gmra.mxu1 %v30_v37  ;;  %v1539_v16 = vor.u32 %v1686_v14, %v1538_v13  ;;  %v1502_v17 = vld [vmem:[%s2347_s3 + $0x118] sm:$0xf]  ;;  %v1678_v18 = vld [vmem:[%s2347_s3 + $0x130] sm:$0xf0]  ;;  %v1510_v22 = vld [vmem:[%s2347_s3 + $0x120] sm:$0xf] }
  0x23   :  { %501 = vmatpush.bf16.msrb.mxu1 %v1638_v33  ;;  %470 = vmatmul.bf16.vlgmr.msra.gmra.mxu2 %v31_v43  ;;  %v1503_v20 = vor.u32 %v1678_v18, %v1502_v17  ;;  %v1504_v21 = vld [vmem:[%s2347_s3 + $0x134] sm:$0xf0]  ;;  %v1679_v23 = vld [vmem:[%s2347_s3 + $0x138] sm:$0xf0]  ;;  %v1474_v26 = vld [vmem:[%s2347_s3 + $0xe0] sm:$0xf] }
  0x24   :  { %521 = vmatpush.bf16.msrb.mxu2 %v1639_v39  ;;  %483 = vmatmul.bf16.vlgmr.msra.gmra.mxu3 %v32_v44  ;;  %v1507_v24 = vor.u32 %v1675_v19, %v1504_v21  ;;  %v1511_v25 = vor.u32 %v1679_v23, %v1510_v22  ;;  %v1671_v27 = vld [vmem:[%s2347_s3 + $0xf8] sm:$0xf0]  ;;  %v1668_v28 = vld [vmem:[%s2347_s3 + $0xe4] sm:$0xf]  ;;  %v1476_v32 = vld [vmem:[%s2347_s3 + $0xfc] sm:$0xf0] }
  0x25   :  { %915 = vmatpush.bf16.msrb.mxu3 %v1559_v2  ;;  %v1475_v31 = vor.u32 %v1671_v27, %v1474_v26  ;;  %v1482_v33 = vld [vmem:[%s2347_s3 + $0xe8] sm:$0xf]  ;;  %v1672_v34 = vld [vmem:[%s2347_s3 + $0x100] sm:$0xf0]  ;;  %v1479_v35 = vor.u32 %v1668_v28, %v1476_v32  ;;  %v1690_v37 = vld [vmem:[%s2347_s3 + $0x194] sm:$0xf] }
  0x26   :  { %489 = vmatpush.bf16.msrb.mxu0 %v1629_v41  ;;  %v1483_v36 = vor.u32 %v1672_v34, %v1482_v33  ;;  %v1568_v38 = vld [vmem:[%s2347_s3 + $0x1ac] sm:$0xf0]  ;;  %v1446_v40 = vld [vmem:[%s2347_s3 + $0xa8] sm:$0xf]  ;;  %v1664_v41 = vld [vmem:[%s2347_s3 + $0xc0] sm:$0xf0] }
  0x27   :  { %502 = vmatpush.bf16.msrb.mxu1 %v1637_v42  ;;  %v1571_v39 = vor.u32 %v1690_v37, %v1568_v38  ;;  %v1661_v42 = vld [vmem:[%s2347_s3 + $0xac] sm:$0xf]  ;;  %v1447_v43 = vor.u32 %v1664_v41, %v1446_v40  ;;  %v1448_v44 = vld [vmem:[%s2347_s3 + $0xc4] sm:$0xf0]  ;;  %v1426_v59 = vld [vmem:[%s2347_s3 + $0x78] sm:$0xf] }
  0x28   :  { %928 = vmatpush.bf16.msra.mxu2 %v1563_v6  ;;  %v1658_v60 = vld [vmem:[%s2347_s3 + $0x90] sm:$0xf0]  ;;  %v1676_v0 = vld [vmem:[%s2347_s3 + $0x124] sm:$0xf]  ;;  %v1512_v1 = vld [vmem:[%s2347_s3 + $0x13c] sm:$0xf0] }
  0x29   :  { %916 = vmatpush.bf16.msrb.mxu3 %v1531_v11  ;;  %v1427_v63 = vor.u32 %v1658_v60, %v1426_v59  ;;  %v1697_v2 = vld [vmem:[%s2346_s2] ss:$0 sm:$0xff]  ;;  %v1515_v4 = vor.u32 %v1676_v0, %v1512_v1  ;;  %v1390_v5 = vld [vmem:[%s2347_s3 + $0x38] sm:$0xf]  ;;  %v1650_v6 = vld [vmem:[%s2347_s3 + $0x50] sm:$0xf0] }
  0x2a   :  { %490 = vmatpush.bf16.msrb.mxu0 %v1628_v45  ;;  %v1454_v45 = vld [vmem:[%s2347_s3 + $0xb0] sm:$0xf]  ;;  %v1391_v8 = vor.u32 %v1650_v6, %v1390_v5  ;;  %v1392_v9 = vld [vmem:[%s2347_s3 + $0x54] sm:$0xf0]  ;;  %v1398_v10 = vld [vmem:[%s2347_s3 + $0x40] sm:$0xf] }
  0x2b   :  { %503 = vmatpush.bf16.msrb.mxu1 %v1636_v46  ;;  %v1665_v46 = vld [vmem:[%s2347_s3 + $0xc8] sm:$0xf0]  ;;  %v1651_v11 = vld [vmem:[%s2347_s3 + $0x58] sm:$0xf0]  ;;  %v1362_v17 = vld [vmem:[%s2347_s3] sm:$0xf] }
  0x2c   :  { %929 = vmatpush.bf16.msra.mxu2 %v1535_v15  ;;  %v1399_v13 = vor.u32 %v1651_v11, %v1398_v10  ;;  %v1669_v14 = vld [vmem:[%s2347_s3 + $0xec] sm:$0xf]  ;;  %v1484_v15 = vld [vmem:[%s2347_s3 + $0x104] sm:$0xf0]  ;;  %v1643_v18 = vld [vmem:[%s2347_s3 + $0x18] sm:$0xf0] }
  0x2d   :  { %917 = vmatpush.bf16.msrb.mxu3 %v1503_v20  ;;  %v1640_v19 = vld [vmem:[%s2347_s3 + $0x4] sm:$0xf]  ;;  %v1363_v21 = vor.u32 %v1643_v18, %v1362_v17  ;;  %v1364_v22 = vld [vmem:[%s2347_s3 + $0x1c] sm:$0xf0]  ;;  %v1370_v23 = vld [vmem:[%s2347_s3 + $0x8] sm:$0xf] }
  0x2e   :  { %491 = vmatpush.bf16.msrb.mxu0 %v1627_v47  ;;  %v1451_v47 = vor.u32 %v1661_v42, %v1448_v44  ;;  %v1367_v26 = vor.u32 %v1640_v19, %v1364_v22  ;;  %v1662_v28 = vld [vmem:[%s2347_s3 + $0xb4] sm:$0xf]  ;;  %v1695_v40 = vld [vmem:[%s2347_s3 + $0x1b8] sm:$0xf0]  ;;  %v1428_v44 = vld [vmem:[%s2347_s3 + $0x94] sm:$0xf0] }
  0x2f   :  { %504 = vmatpush.bf16.msrb.mxu1 %v1635_v48  ;;  %v1455_v48 = vor.u32 %v1665_v46, %v1454_v45  ;;  %v1694_v34 = vld [vmem:[%s2347_s3 + $0x1b0] sm:$0xf0]  ;;  %v1546_v45 = vld [vmem:[%s2347_s3 + $0x160] sm:$0xf]  ;;  %v1680_v60 = vld [vmem:[%s2347_s3 + $0x140] sm:$0xf0] }
  0x30   :  { %930 = vmatpush.bf16.msra.mxu2 %v1507_v24  ;;  %v1644_v24 = vld [vmem:[%s2347_s3 + $0x20] sm:$0xf0]  ;;  %v1526_v1 = vld [vmem:[%s2347_s3 + $0x130] sm:$0xf]  ;;  %v1641_v6 = vld [vmem:[%s2347_s3 + $0xc] sm:$0xf] }
  0x31   :  { %918 = vmatpush.bf16.msrb.mxu3 %v1475_v31  ;;  %v1371_v27 = vor.u32 %v1644_v24, %v1370_v23  ;;  %v1574_v31 = vld [vmem:[%s2347_s3 + $0x198] sm:$0xf]  ;;  %v1674_v18 = vld [vmem:[%s2347_s3 + $0x110] sm:$0xf0]  ;;  %v1663_v24 = vld [vmem:[%s2347_s3 + $0xbc] sm:$0xf] }
  0x32   :  { %492 = vmatpush.bf16.msrb.mxu0 %v1626_v49  ;;  %v1683_v49 = vld [vmem:[%s2347_s3 + $0x15c] sm:$0xf]  ;;  %v1575_v37 = vor.u32 %v1694_v34, %v1574_v31  ;;  %v1498_v17 = vld [vmem:[%s2347_s3 + $0xf8] sm:$0xf]  ;;  %v1666_v23 = vld [vmem:[%s2347_s3 + $0xd0] sm:$0xf0] }
  0x33   :  { %505 = vmatpush.bf16.msrb.mxu1 %v1634_v50  ;;  %1358 = vmatmul.msk.bf16.vlgmr.msrb.gmra.mxu2 %vm432_vm0, %v35_v54  ;;  %v1540_v50 = vld [vmem:[%s2347_s3 + $0x174] sm:$0xf0]  ;;  %v1654_v54 = vld [vmem:[%s2347_s3 + $0x74] sm:$0xf]  ;;  %v1499_v19 = vor.u32 %v1674_v18, %v1498_v17  ;;  %v1659_v34 = vld [vmem:[%s2347_s3 + $0x98] sm:$0xf0] }
  0x34   :  { %931 = vmatpush.bf16.msra.mxu2 %v1479_v35  ;;  %v1543_v51 = vor.u32 %v1683_v49, %v1540_v50  ;;  %v1691_v35 = vld [vmem:[%s2347_s3 + $0x19c] sm:$0xf]  ;;  %v1462_v22 = vld [vmem:[%s2347_s3 + $0xb8] sm:$0xf] }
  0x35   :  { %919 = vmatpush.bf16.msrb.mxu3 %v1447_v43  ;;  %v1655_v43 = vld [vmem:[%s2347_s3 + $0x7c] sm:$0xf] }
  0x36   :  { %493 = vmatpush.bf16.msrb.mxu0 %v1625_v52  ;;  %v1418_v52 = vld [vmem:[%s2347_s3 + $0x70] sm:$0xf]  ;;  %v1431_v46 = vor.u32 %v1655_v43, %v1428_v44  ;;  %v1660_v43 = vld [vmem:[%s2347_s3 + $0xa0] sm:$0xf0]  ;;  %v1406_v44 = vld [vmem:[%s2347_s3 + $0x48] sm:$0xf] }
  0x37   :  { %506 = vmatpush.bf16.msrb.mxu1 %v1633_v53  ;;  %v1657_v53 = vld [vmem:[%s2347_s3 + $0x88] sm:$0xf0] }
  0x38   :  { %932 = vmatpush.bf16.msra.mxu2 %v1451_v47  ;;  %v1684_v47 = vld [vmem:[%s2347_s3 + $0x164] sm:$0xf] }
  0x3a   :  { %494 = vmatpush.bf16.msrb.mxu0 %v1624_v55 }
  0x3b   :  { %507 = vmatpush.bf16.msrb.mxu1 %v1632_v56 }
  0x3e   :  { %495 = vmatpush.bf16.msrb.mxu0 %v1623_v57  ;;  %v1419_v57 = vor.u32 %v1657_v53, %v1418_v52  ;;  %v1688_v52 = vld [vmem:[%s2347_s3 + $0x180] sm:$0xf0] }
  0x3f   :  { %508 = vmatpush.bf16.msrb.mxu1 %v1631_v58  ;;  %v1420_v58 = vld [vmem:[%s2347_s3 + $0x8c] sm:$0xf0] }
  0x40   :  { %920 = vmatpush.bf16.msrb.mxu3 %v1419_v57  ;;  %v1518_v57 = vld [vmem:[%s2347_s3 + $0x128] sm:$0xf] }
  0x41   :  { %496 = vmatmul.bf16.vlgmr.msrb.gmra.mxu0 %v33_v61 }
  0x42   :  { %509 = vmatmul.bf16.vlgmr.msrb.gmra.mxu1 %v34_v62  ;;  %941 = vmatpush.bf16.msra.mxu0 %v1567_v7  ;;  %v1423_v62 = vor.u32 %v1654_v54, %v1420_v58  ;;  %v1647_v7 = vld [vmem:[%s2347_s3 + $0x3c] sm:$0xf] }
  0x43   :  { %954 = vmatpush.bf16.msra.mxu1 %v1571_v39  ;;  %v1395_v12 = vor.u32 %v1647_v7, %v1392_v9  ;;  %v1582_v39 = vld [vmem:[%s2347_s3 + $0x1a0] sm:$0xf]  ;;  %v1372_v7 = vld [vmem:[%s2347_s3 + $0x24] sm:$0xf0] }
  0x44   :  { %933 = vmatpush.bf16.msra.mxu2 %v1423_v62  ;;  %921 = vmatpush.bf16.msrb.mxu3 %v1391_v8  ;;  %v1583_v42 = vor.u32 %v1695_v40, %v1582_v39  ;;  %v1520_v62 = vld [vmem:[%s2347_s3 + $0x144] sm:$0xf0]  ;;  %v1490_v8 = vld [vmem:[%s2347_s3 + $0xf0] sm:$0xf]  ;;  %v1375_v11 = vor.u32 %v1641_v6, %v1372_v7 }
  0x46   :  { %942 = vmatpush.bf16.msra.mxu0 %v1539_v16  ;;  %v1487_v16 = vor.u32 %v1669_v14, %v1484_v15 }
  0x47   :  { %955 = vmatpush.bf16.msra.mxu1 %v1543_v51  ;;  %v1554_v51 = vld [vmem:[%s2347_s3 + $0x168] sm:$0xf] }
  0x48   :  { %934 = vmatpush.bf16.msra.mxu2 %v1395_v12  ;;  %922 = vmatpush.bf16.msrb.mxu3 %v1363_v21  ;;  %v1555_v53 = vor.u32 %v1688_v52, %v1554_v51  ;;  %v1670_v12 = vld [vmem:[%s2347_s3 + $0xf4] sm:$0xf]  ;;  %v1378_v52 = vld [vmem:[%s2347_s3 + $0x10] sm:$0xf] }
  0x4a   :  { %943 = vmatpush.bf16.msra.mxu0 %v1511_v25 }
  0x4b   :  { %956 = vmatpush.bf16.msra.mxu1 %v1515_v4 }
  0x4c   :  { %935 = vmatpush.bf16.msra.mxu2 %v1367_v26  ;;  %967 = vmatpush.bf16.msra.mxu3 %v1575_v37  ;;  %v1463_v26 = vor.u32 %v1666_v23, %v1462_v22  ;;  %v1436_v37 = vld [vmem:[%s2347_s3 + $0x9c] sm:$0xf0] }
  0x4e   :  { %944 = vmatpush.bf16.msra.mxu0 %v1483_v36  ;;  %v1576_v36 = vld [vmem:[%s2347_s3 + $0x1b4] sm:$0xf0] }
  0x4f   :  { %957 = vmatpush.bf16.msra.mxu1 %v1487_v16  ;;  %v1579_v38 = vor.u32 %v1691_v35, %v1576_v36  ;;  %v1656_v35 = vld [vmem:[%s2347_s3 + $0x84] sm:$0xf] }
  0x51   :  { %980 = vmatpush.bf16.msrb.mxu2 %v1579_v38  ;;  %v1442_v38 = vld [vmem:[%s2347_s3 + $0x88] sm:$0xf] }
  0x52   :  { %945 = vmatpush.bf16.msra.mxu0 %v1455_v48  ;;  %v1548_v48 = vld [vmem:[%s2347_s3 + $0x17c] sm:$0xf0] }
  0x53   :  { %v1551_v50 = vor.u32 %v1684_v47, %v1548_v48  ;;  %v1408_v47 = vld [vmem:[%s2347_s3 + $0x64] sm:$0xf0]  ;;  %v1414_v48 = vld [vmem:[%s2347_s3 + $0x50] sm:$0xf] }
  0x55   :  { %981 = vmatpush.bf16.msrb.mxu2 %v1551_v50 }
  0x56   :  { %946 = vmatpush.bf16.msra.mxu0 %v1427_v63  ;;  %v1519_v63 = vor.u32 %v1680_v60, %v1518_v57  ;;  %v1386_v57 = vld [vmem:[%s2347_s3 + $0x18] sm:$0xf] }
  0x5a   :  { %947 = vmatpush.bf16.msra.mxu0 %v1399_v13  ;;  %v1492_v13 = vld [vmem:[%s2347_s3 + $0x10c] sm:$0xf0] }
  0x5b   :  { %v1495_v16 = vor.u32 %v1670_v12, %v1492_v13 }
  0x5e   :  { %948 = vmatpush.bf16.msra.mxu0 %v1371_v27  ;;  %v1464_v27 = vld [vmem:[%s2347_s3 + $0xd4] sm:$0xf0] }
  0x5f   :  { %v1467_v31 = vor.u32 %v1663_v24, %v1464_v27 }
  0x62   :  { %993 = vmatpush.bf16.msrb.mxu0 %v1583_v42  ;;  %v1439_v42 = vor.u32 %v1656_v35, %v1436_v37 }
  0x66   :  { %994 = vmatpush.bf16.msrb.mxu0 %v1555_v53 }
  0x9e   :  { %v2019_v29 = vpop.f32.mrf.mxu0 }
  0x9f   :  { %v2021_v30 = vpop.f32.mrf.mxu1  ;;  %v446_v20 = vadd.f32 %v1697_v2, %v2019_v29  ;;  %v1456_v29 = vld [vmem:[%s2347_s3 + $0xcc] sm:$0xf0]  ;;  %v1681_v2 = vld [vmem:[%s2347_s3 + $0x148] sm:$0xf0] }
  0xa0   :  { %v1459_v33 = vor.u32 %v1662_v28, %v1456_v29  ;;  %v1527_v4 = vor.u32 %v1681_v2, %v1526_v1  ;;  %v1470_v28 = vld [vmem:[%s2347_s3 + $0xc0] sm:$0xf]  ;;  %v1667_v29 = vld [vmem:[%s2347_s3 + $0xd8] sm:$0xf0] }
  0xa1   :  { %v459_v41 = vadd.f32 %v2021_v30, %v446_v20  ;;  %v1687_v30 = vld [vmem:[%s2347_s3 + $0x178] sm:$0xf0] }
  0xa2   :  { %958 = vmatpush.bf16.msra.mxu1 %v1459_v33  ;;  %v1547_v49 = vor.u32 %v1687_v30, %v1546_v45  ;;  %995 = vmatpush.bf16.msrb.mxu0 %v1527_v4  ;;  %v1434_v33 = vld [vmem:[%s2347_s3 + $0x80] sm:$0xf]  ;;  %v1443_v45 = vor.u32 %v1660_v43, %v1442_v38  ;;  %v1649_v30 = vld [vmem:[%s2347_s3 + $0x4c] sm:$0xf] }
  0xa3   :  { %v1411_v51 = vor.u32 %v1649_v30, %v1408_v47 }
  0xa4   :  { %968 = vmatpush.bf16.msra.mxu3 %v1547_v49  ;;  %v1653_v49 = vld [vmem:[%s2347_s3 + $0x68] sm:$0xf0] }
  0xa5   :  { %v1415_v53 = vor.u32 %v1653_v49, %v1414_v48 }
  0xa6   :  { %v447_v55 = vpop.f32.mrf.mxu0  ;;  %v2080_v61 = vpop.f32.mrf.mxu2  ;;  %959 = vmatpush.bf16.msra.mxu1 %v1431_v46  ;;  %996 = vmatpush.bf16.msrb.mxu0 %v1499_v19  ;;  %v1652_v46 = vld [vmem:[%s2347_s3 + $0x60] sm:$0xf0] }
  0xa7   :  { %v460_v56 = vpop.f32.mrf.mxu1  ;;  %v2091_v3 = vpop.f32.mrf.mxu3  ;;  %v472_v54 = vadd.f32 %v2080_v61, %v459_v41  ;;  %v1648_v55 = vld [vmem:[%s2347_s3 + $0x44] sm:$0xf]  ;;  %v1677_v61 = vld [vmem:[%s2347_s3 + $0x12c] sm:$0xf]  ;;  %v1435_v41 = vor.u32 %v1659_v34, %v1434_v33  ;;  %v1407_v50 = vor.u32 %v1652_v46, %v1406_v44 }
  0xa8   :  { %v1400_v56 = vld [vmem:[%s2347_s3 + $0x5c] sm:$0xf0]  ;;  %v1523_v0 = vor.u32 %v1677_v61, %v1520_v62  ;;  %969 = vmatpush.bf16.msra.mxu3 %v1519_v63 }
  0xa9   :  { %v1403_v59 = vor.u32 %v1648_v55, %v1400_v56  ;;  %v485_v5 = vadd.f32 %v2091_v3, %v472_v54  ;;  %v1673_v3 = vld [vmem:[%s2347_s3 + $0x108] sm:$0xf0]  ;;  %v1642_v55 = vld [vmem:[%s2347_s3 + $0x14] sm:$0xf]  ;;  %v1380_v56 = vld [vmem:[%s2347_s3 + $0x2c] sm:$0xf0] }
  0xaa   :  { %982 = vmatpush.bf16.msrb.mxu2 %v1523_v0  ;;  %v1491_v15 = vor.u32 %v1673_v3, %v1490_v8  ;;  %v1645_v54 = vld [vmem:[%s2347_s3 + $0x28] sm:$0xf0]  ;;  %v1383_v62 = vor.u32 %v1642_v55, %v1380_v56  ;;  %v611_v3 = vld [vmem:[%s2348_s4] sm:$0x7f]  ;;  %s1756_s4 = smov [#allocation2]  }
  0xab   :  { %960 = vmatpush.bf16.msra.mxu1 %v1403_v59  ;;  %v1379_v61 = vor.u32 %v1645_v54, %v1378_v52  ;;  %v615_v12 = vperm.slane %v611_v3, 2  ;;  %v616_v13 = vperm.slane %v611_v3, 3  ;;  %v613_v18 = vperm.slane %v611_v3, 0  ;;  %s1151_s0 = sshll.u32 %s1756_s4, 4  ;;  %s1152_s0 = int_to_ptr.vmem [resolvable:$true] %s1151_s0 }
  0xac   :  { %970 = vmatpush.bf16.msra.mxu3 %v1491_v15  ;;  %v614_v19 = vperm.slane %v611_v3, 1  ;;  %v619_v37 = vperm.slane %v611_v3, 6  ;;  %v617_v44 = vperm.slane %v611_v3, 4 }
  0xae   :  { %v473_v25 = vpop.f32.mrf.mxu2  ;;  %983 = vmatpush.bf16.msrb.mxu2 %v1495_v16 }
  0xaf   :  { %v486_v32 = vpop.f32.mrf.mxu3  ;;  %961 = vmatpush.bf16.msra.mxu1 %v1375_v11 }
  0xb0   :  { %v1471_v32 = vor.u32 %v1667_v29, %v1470_v28  ;;  %971 = vmatpush.bf16.msra.mxu3 %v1463_v26 }
  0xb2   :  { %984 = vmatpush.bf16.msrb.mxu2 %v1467_v31  ;;  %997 = vmatpush.bf16.msrb.mxu0 %v1471_v32 }
  0xb4   :  { %972 = vmatpush.bf16.msra.mxu3 %v1435_v41 }
  0xb6   :  { %v523_v58 = vpop.f32.mrf.mxu2  ;;  %985 = vmatpush.bf16.msrb.mxu2 %v1439_v42  ;;  %998 = vmatpush.bf16.msrb.mxu0 %v1443_v45  ;;  %v618_v45 = vperm.slane %v611_v3, 5 }
  0xb8   :  { %973 = vmatpush.bf16.msra.mxu3 %v1407_v50 }
  0xba   :  { %986 = vmatpush.bf16.msrb.mxu2 %v1411_v51  ;;  %999 = vmatpush.bf16.msrb.mxu0 %v1415_v53 }
  0xbc   :  { %974 = vmatpush.bf16.msra.mxu3 %v1379_v61 }
  0xbe   :  { %v497_v9 = vpop.f32.mrf.mxu0  ;;  %v525_v21 = vpop.f32.mrf.mxu2  ;;  %987 = vmatpush.bf16.msrb.mxu2 %v1383_v62 }
  0xbf   :  { %v510_v10 = vpop.f32.mrf.mxu1  ;;  %v498_v14 = vadd.f32 %v497_v9, %v485_v5 }
  0xc1   :  { %v511_v20 = vadd.f32 %v510_v10, %v498_v14 }
  0xc3   :  { %v524_v25 = vadd.f32 %v523_v58, %v511_v20  ;;  %v1646_v58 = vld [vmem:[%s2347_s3 + $0x30] sm:$0xf0] }
  0xc4   :  { %v1387_v63 = vor.u32 %v1646_v58, %v1386_v57 }
  0xc5   :  { %v1359_v36 = vmul.f32 -1.442695, %v524_v25 }
  0xc6   :  { %v499_v39 = vpop.f32.mrf.mxu0  ;;  %1000 = vmatpush.bf16.msrb.mxu0 %v1387_v63 }
  0xc7   :  { %v512_v40 = vpop.f32.mrf.mxu1  ;;  %1698 = vpow2.f32 %v1359_v36 }
  0xcd   :  { %v1699_v59 = vpop.eup %1698 }
  0xce   :  { %v530_v60 = vadd.f32 1.0, %v1699_v59 }
  0xd0   :  { %1700 = vrcp.f32 %v530_v60  ;;  %v542_v4 = vand.u32 2147483648, %v530_v60  ;;  %v540_v6 = vand.u32 2147483647, %v530_v60  ;;  %vm536_vm2 = vweird.f32 %v530_v60 }
  0xd2   :  { %v543_v8 = vor.u32 1.1754944e-38, %v542_v4  ;;  %vm541_vm4 = vcmp.eq.f32.partialorder %v540_v6, 8.507059e+37 }
  0xd6   :  { %v1701_v0 = vpop.eup %1700 }
  0xd7   :  { %v532_v1 = vmul.f32 %v1701_v0, %v530_v60  ;;  %vm537_vm1 = vweird.f32 %v1701_v0 }
  0xd8   :  { %vm538_vm3 = vmor %vm536_vm2, %vm537_vm1 }
  0xd9   :  { %v533_v2 = vsub.f32 1.0, %v532_v1 }
  0xdb   :  { %v534_v5 = vmul.f32 %v1701_v0, %v533_v2 }
  0xdd   :  { %v535_v7 = vadd.f32 %v1701_v0, %v534_v5 }
  0xdf   :  { %v539_v9 = vsel %vm538_vm3, %v1701_v0, %v535_v7 }
  0xe0   :  { %v544_v10 = vsel %vm541_vm4, %v543_v8, %v539_v9 }
  0xe1   :  { %v546_v11 = vpack.c.bf16 %v544_v10, %v544_v10 }
  0xe3   :  { %923 = vmatmul.bf16.vlgmr.msrb.gmra.mxu3 %v546_v11  ;;  %936 = vmatmul.bf16.vlgmr.msra.gmra.mxu2 %v546_v11 }
  0xe4   :  { %949 = vmatmul.bf16.vlgmr.msra.gmra.mxu0 %v546_v11  ;;  %962 = vmatmul.bf16.vlgmr.msra.gmra.mxu1 %v546_v11 }
  0xf3   :  { %975 = vmatmul.bf16.vlgmr.msra.gmra.mxu3 %v546_v11  ;;  %988 = vmatmul.bf16.vlgmr.msrb.gmra.mxu2 %v546_v11 }
  0xf4   :  { %1001 = vmatmul.bf16.vlgmr.msrb.gmra.mxu0 %v546_v11 }
 0x161   :  { %v950_v14 = vpop.f32.mrf.mxu0  ;;  %v963_v15 = vpop.f32.mrf.mxu1 }
 0x162   :  { %v951_v16 = vadd.f32 %v950_v14, %v615_v12  ;;  %v964_v17 = vadd.f32 %v963_v15, %v616_v13 }
 0x164   :  { %v1586_v20 = vmul.f32 -1.442695, %v951_v16  ;;  %v1587_v21 = vmul.f32 -1.442695, %v964_v17 }
 0x166   :  { %1702 = vpow2.f32 %v1586_v20  ;;  %v924_v22 = vpop.f32.mrf.mxu3  ;;  %v937_v23 = vpop.f32.mrf.mxu2 }
 0x167   :  { %1704 = vpow2.f32 %v1587_v21  ;;  %v925_v24 = vadd.f32 %v924_v22, %v613_v18  ;;  %v938_v25 = vadd.f32 %v937_v23, %v614_v19 }
 0x169   :  { %v1584_v26 = vmul.f32 -1.442695, %v925_v24  ;;  %v1585_v27 = vmul.f32 -1.442695, %v938_v25  ;;  %v952_v28 = vpop.f32.mrf.mxu0  ;;  %v965_v29 = vpop.f32.mrf.mxu1 }
 0x16b   :  { %1706 = vpow2.f32 %v1584_v26 }
 0x16c   :  { %v1703_v31 = vpop.eup %1702  ;;  %1708 = vpow2.f32 %v1585_v27 }
 0x16d   :  { %v1705_v32 = vpop.eup %1704  ;;  %v1029_v33 = vadd.f32 1.0, %v1703_v31 }
 0x16e   :  { %v1030_v34 = vadd.f32 1.0, %v1705_v32  ;;  %v926_v35 = vpop.f32.mrf.mxu3  ;;  %v939_v36 = vpop.f32.mrf.mxu2 }
 0x16f   :  { %1710 = vrcp.f32 %v1029_v33  ;;  %v1073_v30 = vand.u32 2147483647, %v1029_v33  ;;  %v1075_v47 = vand.u32 2147483648, %v1029_v33  ;;  %vm1069_vm5 = vweird.f32 %v1029_v33 }
 0x170   :  { %1712 = vrcp.f32 %v1030_v34  ;;  %vm1084_vm6 = vweird.f32 %v1030_v34  ;;  %v1088_v53 = vand.u32 2147483647, %v1030_v34  ;;  %v1090_v54 = vand.u32 2147483648, %v1030_v34 }
 0x171   :  { %v1707_v38 = vpop.eup %1706  ;;  %v1002_v39 = vpop.f32.mrf.mxu0  ;;  %vm2316_vm8 = vcmp.eq.f32.partialorder %v1073_v30, 8.507059e+37  ;;  %v1076_v60 = vor.u32 1.1754944e-38, %v1075_v47 }
 0x172   :  { %v1709_v40 = vpop.eup %1708  ;;  %v2310_v41 = vadd.f32 1.0, %v1707_v38  ;;  %v1003_v43 = vadd.f32 %v1002_v39, %v619_v37  ;;  %vm2320_vm10 = vcmp.eq.f32.partialorder %v1088_v53, 8.507059e+37  ;;  %v1091_v9 = vor.u32 1.1754944e-38, %v1090_v54 }
 0x173   :  { %v2312_v42 = vadd.f32 1.0, %v1709_v40 }
 0x174   :  { %1714 = vrcp.f32 %v2310_v41  ;;  %v1590_v56 = vmul.f32 -1.442695, %v1003_v43  ;;  %v1043_v12 = vand.u32 2147483647, %v2310_v41  ;;  %v1045_v14 = vand.u32 2147483648, %v2310_v41 }
 0x175   :  { %v1711_v46 = vpop.eup %1710  ;;  %1716 = vrcp.f32 %v2312_v42  ;;  %v1060_v16 = vand.u32 2147483648, %v2312_v42  ;;  %v1058_v25 = vand.u32 2147483647, %v2312_v42  ;;  %vm1039_vm15 = vweird.f32 %v2310_v41 }
 0x176   :  { %v1713_v48 = vpop.eup %1712  ;;  %v1065_v49 = vmul.f32 %v1711_v46, %v1029_v33  ;;  %v976_v50 = vpop.f32.mrf.mxu3  ;;  %vm1070_vm7 = vweird.f32 %v1711_v46  ;;  %1718 = vpow2.f32 %v1590_v56  ;;  %v1046_v29 = vor.u32 1.1754944e-38, %v1045_v14 }
 0x177   :  { %v989_v51 = vpop.f32.mrf.mxu2  ;;  %v1080_v52 = vmul.f32 %v1713_v48, %v1030_v34  ;;  %v977_v57 = vadd.f32 %v976_v50, %v617_v44  ;;  %vm1085_vm9 = vweird.f32 %v1713_v48  ;;  %vm1071_vm11 = vmor %vm1069_vm5, %vm1070_vm7  ;;  %vm1054_vm2 = vweird.f32 %v2312_v42 }
 0x178   :  { %v1066_v55 = vsub.f32 1.0, %v1065_v49  ;;  %v990_v58 = vadd.f32 %v989_v51, %v618_v45  ;;  %vm1086_vm12 = vmor %vm1084_vm6, %vm1085_vm9  ;;  %vm1044_vm3 = vcmp.eq.f32.partialorder %v1043_v12, 8.507059e+37  ;;  %v1061_v34 = vor.u32 1.1754944e-38, %v1060_v16 }
 0x179   :  { %v1081_v61 = vsub.f32 1.0, %v1080_v52  ;;  %v1004_v62 = vpop.f32.mrf.mxu0  ;;  %v1588_v1 = vmul.f32 -1.442695, %v977_v57  ;;  %vm1059_vm5 = vcmp.eq.f32.partialorder %v1058_v25, 8.507059e+37 }
 0x17a   :  { %v1715_v63 = vpop.eup %1714  ;;  %v1067_v0 = vmul.f32 %v1711_v46, %v1066_v55  ;;  %v1589_v2 = vmul.f32 -1.442695, %v990_v58 }
 0x17b   :  { %v1717_v4 = vpop.eup %1716  ;;  %v1082_v5 = vmul.f32 %v1713_v48, %v1081_v61  ;;  %v1035_v7 = vmul.f32 %v1715_v63, %v2310_v41  ;;  %1720 = vpow2.f32 %v1588_v1  ;;  %vm1040_vm13 = vweird.f32 %v1715_v63 }
 0x17c   :  { %v1068_v8 = vadd.f32 %v1711_v46, %v1067_v0  ;;  %v1050_v10 = vmul.f32 %v1717_v4, %v2312_v42  ;;  %1722 = vpow2.f32 %v1589_v2  ;;  %v1719_v22 = vpop.eup %1718  ;;  %vm1055_vm14 = vweird.f32 %v1717_v4  ;;  %vm1041_vm1 = vmor %vm1039_vm15, %vm1040_vm13 }
 0x17d   :  { %v1083_v11 = vadd.f32 %v1713_v48, %v1082_v5  ;;  %v1036_v3 = vsub.f32 1.0, %v1035_v7  ;;  %v1033_v27 = vadd.f32 1.0, %v1719_v22  ;;  %vm1056_vm4 = vmor %vm1054_vm2, %vm1055_vm14 }
 0x17e   :  { %v1072_v13 = vsel %vm1071_vm11, %v1711_v46, %v1068_v8  ;;  %v1051_v15 = vsub.f32 1.0, %v1050_v10  ;;  %v978_v17 = vpop.f32.mrf.mxu3 }
 0x17f   :  { %v991_v18 = vpop.f32.mrf.mxu2  ;;  %v1077_v19 = vsel %vm2316_vm8, %v1076_v60, %v1072_v13  ;;  %v1087_v20 = vsel %vm1086_vm12, %v1713_v48, %v1083_v11  ;;  %v1037_v21 = vmul.f32 %v1715_v63, %v1036_v3  ;;  %1724 = vrcp.f32 %v1033_v27 }
 0x180   :  { %1141 = vst [vmem:[#allocation2 + $0x10] sm:$0xff] %v1077_v19  ;;  %v1092_v23 = vsel %vm2320_vm10, %v1091_v9, %v1087_v20  ;;  %v1052_v24 = vmul.f32 %v1717_v4, %v1051_v15  ;;  %v1133_v43 = vand.u32 2147483647, %v1033_v27  ;;  %v1135_v45 = vand.u32 2147483648, %v1033_v27 }
 0x181   :  { %1142 = vst [vmem:[#allocation2 + $0x18] sm:$0xff] %v1092_v23  ;;  %v1038_v26 = vadd.f32 %v1715_v63, %v1037_v21  ;;  %v1721_v28 = vpop.eup %1720  ;;  %vm1129_vm7 = vweird.f32 %v1033_v27 }
 0x182   :  { %v1053_v31 = vadd.f32 %v1717_v4, %v1052_v24  ;;  %v1723_v32 = vpop.eup %1722  ;;  %v1031_v37 = vadd.f32 1.0, %v1721_v28  ;;  %vm1134_vm8 = vcmp.eq.f32.partialorder %v1133_v43, 8.507059e+37  ;;  %v1136_v51 = vor.u32 1.1754944e-38, %v1135_v45 }
 0x183   :  { %v1042_v33 = vsel %vm1041_vm1, %v1715_v63, %v1038_v26  ;;  %v1032_v39 = vadd.f32 1.0, %v1723_v32 }
 0x184   :  { %v1047_v35 = vsel %vm1044_vm3, %v1046_v29, %v1042_v33  ;;  %v1057_v36 = vsel %vm1056_vm4, %v1717_v4, %v1053_v31  ;;  %1726 = vrcp.f32 %v1031_v37  ;;  %v1105_v52 = vand.u32 2147483648, %v1031_v37 }
 0x185   :  { %1139 = vst [vmem:[#allocation2] sm:$0xff] %v1047_v35  ;;  %v1062_v38 = vsel %vm1059_vm5, %v1061_v34, %v1057_v36  ;;  %1728 = vrcp.f32 %v1032_v39  ;;  %v1725_v40 = vpop.eup %1724  ;;  %v1103_v55 = vand.u32 2147483647, %v1031_v37  ;;  %v1120_v56 = vand.u32 2147483648, %v1032_v39 }
 0x186   :  { %1140 = vst [vmem:[#allocation2 + $0x8] sm:$0xff] %v1062_v38  ;;  %v1125_v41 = vmul.f32 %v1725_v40, %v1033_v27  ;;  %vm1130_vm6 = vweird.f32 %v1725_v40  ;;  %v1118_v59 = vand.u32 2147483647, %v1032_v39  ;;  %vm1099_vm12 = vweird.f32 %v1031_v37 }
 0x187   :  { %vm1131_vm9 = vmor %vm1129_vm7, %vm1130_vm6  ;;  %v1106_v62 = vor.u32 1.1754944e-38, %v1105_v52  ;;  %vm1114_vm14 = vweird.f32 %v1032_v39  ;;  %vm1104_vm15 = vcmp.eq.f32.partialorder %v1103_v55, 8.507059e+37  ;;  %v1121_v1 = vor.u32 1.1754944e-38, %v1120_v56 }
 0x188   :  { %v1126_v44 = vsub.f32 1.0, %v1125_v41  ;;  %vm1119_vm2 = vcmp.eq.f32.partialorder %v1118_v59, 8.507059e+37 }
 0x18a   :  { %v1727_v42 = vpop.eup %1726  ;;  %v1127_v47 = vmul.f32 %v1725_v40, %v1126_v44 }
 0x18b   :  { %v1729_v46 = vpop.eup %1728  ;;  %v1095_v30 = vmul.f32 %v1727_v42, %v1031_v37  ;;  %vm1100_vm10 = vweird.f32 %v1727_v42 }
 0x18c   :  { %v1110_v48 = vmul.f32 %v1729_v46, %v1032_v39  ;;  %v1128_v50 = vadd.f32 %v1725_v40, %v1127_v47  ;;  %vm1115_vm11 = vweird.f32 %v1729_v46  ;;  %vm1101_vm13 = vmor %vm1099_vm12, %vm1100_vm10 }
 0x18d   :  { %v1096_v49 = vsub.f32 1.0, %v1095_v30  ;;  %vm1116_vm1 = vmor %vm1114_vm14, %vm1115_vm11 }
 0x18e   :  { %v1111_v53 = vsub.f32 1.0, %v1110_v48  ;;  %v1132_v57 = vsel %vm1131_vm9, %v1725_v40, %v1128_v50 }
 0x18f   :  { %v1097_v54 = vmul.f32 %v1727_v42, %v1096_v49  ;;  %v1137_v60 = vsel %vm1134_vm8, %v1136_v51, %v1132_v57 }
 0x190   :  { %v1112_v58 = vmul.f32 %v1729_v46, %v1111_v53  ;;  %1145 = vst.msk [vmem:[#allocation2 + $0x30] sm:$0xff] %vm432_vm0, %v1137_v60 }
 0x191   :  { %v1098_v61 = vadd.f32 %v1727_v42, %v1097_v54 }
 0x192   :  { %v1113_v63 = vadd.f32 %v1729_v46, %v1112_v58 }
 0x193   :  { %v1102_v0 = vsel %vm1101_vm13, %v1727_v42, %v1098_v61 }
 0x194   :  { %v1107_v2 = vsel %vm1104_vm15, %v1106_v62, %v1102_v0  ;;  %v1117_v4 = vsel %vm1116_vm1, %v1729_v46, %v1113_v63 }
 0x195   :  { %1143 = vst [vmem:[#allocation2 + $0x20] sm:$0xff] %v1107_v2  ;;  %v1122_v5 = vsel %vm1119_vm2, %v1121_v1, %v1117_v4 }
 0x196   :  { %1144 = vst [vmem:[#allocation2 + $0x28] sm:$0xff] %v1122_v5 }
 0x197   :  { %1156 = dma.vmem_to_hbm [thread:$0]  %s1152_s0, 896, %s1154_s12, [#allocation3]  }
 0x198   :  { %1754 = dma.done.wait [#allocation3], 896  }
 0x199   :  { %1755 = vsyncadd [#allocation3], 4294966400 }
 0x19a   :  { %1161 = vsyncpa [#allocation3], 1 }

</bundles_post_ra>
